<compile_context>
chip_gen: v5e
topology: v5e:2x2
jax: 0.10.0
libtpu: 0.0.40
codegen_flags: <defaults>
</compile_context>

<pallas_src>
import functools

import jax
import jax.numpy as jnp
from jax.experimental import pallas as pl
from jax.experimental.pallas import tpu as pltpu


def _round_up(x, m):
    return (x + m - 1) // m * m


def dan_kernel(ids_ref, tab_ref, w1_ref, b1_ref, w2_ref, b2_ref, out_ref, *,
               seq_len, vocab_pad, tile_b):
    """One batch tile of the DAN forward pass (all operands already in VMEM).

    ids_ref : VMEM [S, TB] int32     token ids for this tile (batch on lanes)
    tab_ref : VMEM [V_pad, E_pad]    embedding table (resident across grid steps)
    w1_ref  : VMEM [E_pad, H_pad]
    b1_ref  : VMEM [1, H_pad]
    w2_ref  : VMEM [H_pad, N_pad]
    b2_ref  : VMEM [1, N_pad]
    out_ref : VMEM [TB, N_pad]       lane-dense padded logits
    """
    # ---- token-count matrix: counts[v, b] = #{s : ids[b, s] == v} --------------
    # Vocab on sublanes, batch on lanes: each per-position compare is a cheap
    # sublane broadcast of one id row against an iota (pure VPU work, no XLU).
    vocab_iota = jax.lax.broadcasted_iota(jnp.int32, (vocab_pad, tile_b), 0)

    def accum(s, counts):
        tok = ids_ref[pl.ds(s, 1), :]                            # [1, TB] int32
        return counts + (vocab_iota == tok).astype(jnp.float32)

    counts = jax.lax.fori_loop(
        0, seq_len, accum,
        jnp.zeros((vocab_pad, tile_b), jnp.float32),
        unroll=(seq_len <= 32))

    # ---- mean embedding as one MXU matmul: avg = (counts^T @ table) / S --------
    avg = jax.lax.dot_general(
        counts, tab_ref[...],
        dimension_numbers=(((0,), (0,)), ((), ())),              # contract vocab axis
        preferred_element_type=jnp.float32) * (1.0 / seq_len)    # [TB, E_pad]

    # ---- fc1 + ReLU, fc2 (MXU, f32 accumulation) --------------------------------
    h = jnp.dot(avg, w1_ref[...], preferred_element_type=jnp.float32)
    h = jnp.maximum(h + b1_ref[...], 0.0)                        # [TB, H_pad]
    logits = jnp.dot(h, w2_ref[...], preferred_element_type=jnp.float32)
    out_ref[...] = logits + b2_ref[...]                          # lane-dense store


def dan_forward(token_ids, emb_table, w1, b1, w2, b2):
    """DAN forward: logits = fc2(relu(fc1(mean(embed(ids), axis=1)))).

    token_ids: [B, S] int32; emb_table: [V, E];
    w1: [E, H], b1: [H], w2: [H, 2], b2: [2]   (weights stored as [in, out]).
    """
    B, S = token_ids.shape
    V, E = emb_table.shape
    H = w1.shape[1]
    n_out = w2.shape[1]

    # Lane-dense padding of matmul dims; zero padding of table/weights is exact.
    E_pad = _round_up(E, 128)
    H_pad = _round_up(H, 128)
    N_pad = _round_up(n_out, 128)
    V_pad = _round_up(V, 8)           # vocab is a sublane / contraction dim only

    # Batch tile: either one tile covering the whole (8-aligned) batch, or 128-row
    # tiles (keeps the ids block's lane dim legal: TB % 128 == 0 or TB == B_pad),
    # which also gives >= 2 grid steps for batches > 128 so both v7x cores work.
    B_pad8 = _round_up(B, 8)
    TB = B_pad8 if B_pad8 <= 128 else 128
    B_pad = _round_up(B, TB)
    grid = (B_pad // TB,)

    tab_p = jnp.pad(emb_table.astype(jnp.float32), ((0, V_pad - V), (0, E_pad - E)))
    w1_p = jnp.pad(w1.astype(jnp.float32), ((0, E_pad - E), (0, H_pad - H)))
    b1_p = jnp.pad(b1.astype(jnp.float32), (0, H_pad - H)).reshape(1, H_pad)
    w2_p = jnp.pad(w2.astype(jnp.float32), ((0, H_pad - H), (0, N_pad - n_out)))
    b2_p = jnp.pad(b2.astype(jnp.float32), (0, N_pad - n_out)).reshape(1, N_pad)

    # ids laid out [S, B_pad] so the kernel's per-position row read is a clean
    # sublane slice; padded batch rows use token 0 and are sliced off afterwards.
    ids_t = jnp.pad(token_ids.astype(jnp.int32).T, ((0, 0), (0, B_pad - B)))

    # VMEM budget from actual buffer sizes (resident blocks counted x2 for the
    # pipeline's buffering) + in-kernel temporaries + headroom.
    by = 4
    weight_bytes = (V_pad * E_pad + E_pad * H_pad + H_pad + H_pad * N_pad + N_pad) * by
    tile_bytes = (2 * S * TB            # ids blocks (int32, double-buffered)
                  + 2 * TB * N_pad      # logits out (double-buffered)
                  + V_pad * TB          # counts temporary
                  + TB * (E_pad + H_pad)  # avg / h temporaries
                  ) * by
    vmem_need = 2 * weight_bytes + tile_bytes
    if vmem_need > 56 * 1024 * 1024:
        # TODO(synk): for vocabularies too large to keep the padded table resident
        # in VMEM, add a double-buffered HBM row-gather fallback (chunked over the
        # sequence) instead of the one-hot MXU path.
        raise NotImplementedError(
            "Embedding table too large for the VMEM-resident one-hot gather path.")
    vmem_limit = int(min(max(vmem_need + (4 << 20), 16 << 20), 64 << 20))

    kernel = functools.partial(dan_kernel, seq_len=S, vocab_pad=V_pad, tile_b=TB)

    out = pl.pallas_call(
        kernel,
        out_shape=jax.ShapeDtypeStruct((B_pad, N_pad), jnp.float32),
        grid=grid,
        in_specs=[
            pl.BlockSpec((S, TB), lambda i: (0, i)),          # per-tile token ids
            pl.BlockSpec((V_pad, E_pad), lambda i: (0, 0)),   # table resident in VMEM
            pl.BlockSpec((E_pad, H_pad), lambda i: (0, 0)),   # weights resident
            pl.BlockSpec((1, H_pad), lambda i: (0, 0)),
            pl.BlockSpec((H_pad, N_pad), lambda i: (0, 0)),
            pl.BlockSpec((1, N_pad), lambda i: (0, 0)),
        ],
        out_specs=pl.BlockSpec((TB, N_pad), lambda i: (i, 0)),
        compiler_params=pltpu.CompilerParams(
            dimension_semantics=("parallel",),                # batch tiles across TCs
            vmem_limit_bytes=vmem_limit,
        ),
    )(ids_t, tab_p, w1_p, b1_p, w2_p, b2_p)

    return out[:B, :n_out]


def dan_reference(token_ids, emb_table, w1, b1, w2, b2):
    """Pure-JAX reference matching the PyTorch forward exactly."""
    embeddings = jnp.take(emb_table, token_ids, axis=0)
    avg = jnp.mean(embeddings, axis=1)
    h = jnp.maximum(avg @ w1 + b1, 0.0)
    return h @ w2 + b2


if __name__ == "__main__":
    # Small, deterministic shapes consistent with the module.
    B, S = 2, 8            # batch, sequence length
    V, E, H = 50, 32, 32   # vocab size, embedding_dim, hidden_dim
    N_CLASSES = 2

    key = jax.random.PRNGKey(0)
    k_tok, k_emb, k_w1, k_b1, k_w2, k_b2 = jax.random.split(key, 6)

    token_ids = jax.random.randint(k_tok, (B, S), 0, V, dtype=jnp.int32)
    emb_table = jax.random.normal(k_emb, (V, E), dtype=jnp.float32) * 0.1
    # Stored pre-transposed ([in, out]) relative to nn.Linear's [out, in].
    w1 = jax.random.normal(k_w1, (E, H), dtype=jnp.float32) * 0.1
    b1 = jax.random.normal(k_b1, (H,), dtype=jnp.float32) * 0.1
    w2 = jax.random.normal(k_w2, (H, N_CLASSES), dtype=jnp.float32) * 0.1
    b2 = jax.random.normal(k_b2, (N_CLASSES,), dtype=jnp.float32) * 0.1

    logits = dan_forward(token_ids, emb_table, w1, b1, w2, b2)
    jax.block_until_ready(logits)

    ref = dan_reference(token_ids, emb_table, w1, b1, w2, b2)
    assert logits.shape == (B, N_CLASSES)
    # MXU f32 matmuls (multi-pass) vs the pure-JAX reference: allow a small tolerance.
    assert jnp.allclose(logits, ref, atol=1e-4, rtol=1e-4), (logits, ref)

    print("KERNEL_OK")
</pallas_src>

<mosaic_0001>
module attributes {stable_mosaic.version = 11 : i64} {
  func.func @dan_kernel(%arg0: i32, %arg1: memref<8x8xi32, #tpu.memory_space<vmem>>, %arg2: memref<56x128xf32, #tpu.memory_space<vmem>>, %arg3: memref<128x128xf32, #tpu.memory_space<vmem>>, %arg4: memref<1x128xf32, #tpu.memory_space<vmem>>, %arg5: memref<128x128xf32, #tpu.memory_space<vmem>>, %arg6: memref<1x128xf32, #tpu.memory_space<vmem>>, %arg7: memref<8x128xf32, #tpu.memory_space<vmem>>) attributes {dimension_semantics = [#tpu.dimension_semantics<parallel>], iteration_bounds = array<i64: 1>, scalar_prefetch = 0 : i64, scratch_operands = 0 : i64, tpu.core_type = #tpu.core_type<tc>, window_params = [{transform_indices = @transform_0, window_bounds = array<i64: 8, 8>}, {pipeline_mode = #tpu.pipeline_mode<synchronous>, transform_indices = @transform_1, window_bounds = array<i64: 56, 128>}, {pipeline_mode = #tpu.pipeline_mode<synchronous>, transform_indices = @transform_2, window_bounds = array<i64: 128, 128>}, {pipeline_mode = #tpu.pipeline_mode<synchronous>, transform_indices = @transform_3, window_bounds = array<i64: 1, 128>}, {pipeline_mode = #tpu.pipeline_mode<synchronous>, transform_indices = @transform_4, window_bounds = array<i64: 128, 128>}, {pipeline_mode = #tpu.pipeline_mode<synchronous>, transform_indices = @transform_5, window_bounds = array<i64: 1, 128>}, {transform_indices = @transform_6, window_bounds = array<i64: 8, 128>}]} {
    %0 = tpu.iota {dimensions = array<i32: 0>} : vector<56x8xi32>
    %cst = arith.constant 0.000000e+00 : f32
    %1 = vector.broadcast %cst : f32 to vector<56x8xf32>
    %c0_i32 = arith.constant 0 : i32
    %2 = arith.index_cast %c0_i32 : i32 to index
    %c0 = arith.constant 0 : index
    %3 = vector.load %arg1[%2, %c0] : memref<8x8xi32, #tpu.memory_space<vmem>>, vector<1x8xi32>
    %4 = vector.broadcast %3 : vector<1x8xi32> to vector<56x8xi32>
    %5 = arith.cmpi eq, %0, %4 : vector<56x8xi32>
    %6 = arith.extui %5 : vector<56x8xi1> to vector<56x8xi32>
    %7 = arith.sitofp %6 : vector<56x8xi32> to vector<56x8xf32>
    %8 = arith.addf %1, %7 : vector<56x8xf32>
    %c1_i32 = arith.constant 1 : i32
    %9 = arith.index_cast %c1_i32 : i32 to index
    %c0_0 = arith.constant 0 : index
    %10 = vector.load %arg1[%9, %c0_0] : memref<8x8xi32, #tpu.memory_space<vmem>>, vector<1x8xi32>
    %11 = vector.broadcast %10 : vector<1x8xi32> to vector<56x8xi32>
    %12 = arith.cmpi eq, %0, %11 : vector<56x8xi32>
    %13 = arith.extui %12 : vector<56x8xi1> to vector<56x8xi32>
    %14 = arith.sitofp %13 : vector<56x8xi32> to vector<56x8xf32>
    %15 = arith.addf %8, %14 : vector<56x8xf32>
    %c2_i32 = arith.constant 2 : i32
    %16 = arith.index_cast %c2_i32 : i32 to index
    %c0_1 = arith.constant 0 : index
    %17 = vector.load %arg1[%16, %c0_1] : memref<8x8xi32, #tpu.memory_space<vmem>>, vector<1x8xi32>
    %18 = vector.broadcast %17 : vector<1x8xi32> to vector<56x8xi32>
    %19 = arith.cmpi eq, %0, %18 : vector<56x8xi32>
    %20 = arith.extui %19 : vector<56x8xi1> to vector<56x8xi32>
    %21 = arith.sitofp %20 : vector<56x8xi32> to vector<56x8xf32>
    %22 = arith.addf %15, %21 : vector<56x8xf32>
    %c3_i32 = arith.constant 3 : i32
    %23 = arith.index_cast %c3_i32 : i32 to index
    %c0_2 = arith.constant 0 : index
    %24 = vector.load %arg1[%23, %c0_2] : memref<8x8xi32, #tpu.memory_space<vmem>>, vector<1x8xi32>
    %25 = vector.broadcast %24 : vector<1x8xi32> to vector<56x8xi32>
    %26 = arith.cmpi eq, %0, %25 : vector<56x8xi32>
    %27 = arith.extui %26 : vector<56x8xi1> to vector<56x8xi32>
    %28 = arith.sitofp %27 : vector<56x8xi32> to vector<56x8xf32>
    %29 = arith.addf %22, %28 : vector<56x8xf32>
    %c4_i32 = arith.constant 4 : i32
    %30 = arith.index_cast %c4_i32 : i32 to index
    %c0_3 = arith.constant 0 : index
    %31 = vector.load %arg1[%30, %c0_3] : memref<8x8xi32, #tpu.memory_space<vmem>>, vector<1x8xi32>
    %32 = vector.broadcast %31 : vector<1x8xi32> to vector<56x8xi32>
    %33 = arith.cmpi eq, %0, %32 : vector<56x8xi32>
    %34 = arith.extui %33 : vector<56x8xi1> to vector<56x8xi32>
    %35 = arith.sitofp %34 : vector<56x8xi32> to vector<56x8xf32>
    %36 = arith.addf %29, %35 : vector<56x8xf32>
    %c5_i32 = arith.constant 5 : i32
    %37 = arith.index_cast %c5_i32 : i32 to index
    %c0_4 = arith.constant 0 : index
    %38 = vector.load %arg1[%37, %c0_4] : memref<8x8xi32, #tpu.memory_space<vmem>>, vector<1x8xi32>
    %39 = vector.broadcast %38 : vector<1x8xi32> to vector<56x8xi32>
    %40 = arith.cmpi eq, %0, %39 : vector<56x8xi32>
    %41 = arith.extui %40 : vector<56x8xi1> to vector<56x8xi32>
    %42 = arith.sitofp %41 : vector<56x8xi32> to vector<56x8xf32>
    %43 = arith.addf %36, %42 : vector<56x8xf32>
    %c6_i32 = arith.constant 6 : i32
    %44 = arith.index_cast %c6_i32 : i32 to index
    %c0_5 = arith.constant 0 : index
    %45 = vector.load %arg1[%44, %c0_5] : memref<8x8xi32, #tpu.memory_space<vmem>>, vector<1x8xi32>
    %46 = vector.broadcast %45 : vector<1x8xi32> to vector<56x8xi32>
    %47 = arith.cmpi eq, %0, %46 : vector<56x8xi32>
    %48 = arith.extui %47 : vector<56x8xi1> to vector<56x8xi32>
    %49 = arith.sitofp %48 : vector<56x8xi32> to vector<56x8xf32>
    %50 = arith.addf %43, %49 : vector<56x8xf32>
    %c7_i32 = arith.constant 7 : i32
    %51 = arith.index_cast %c7_i32 : i32 to index
    %c0_6 = arith.constant 0 : index
    %52 = vector.load %arg1[%51, %c0_6] : memref<8x8xi32, #tpu.memory_space<vmem>>, vector<1x8xi32>
    %53 = vector.broadcast %52 : vector<1x8xi32> to vector<56x8xi32>
    %54 = arith.cmpi eq, %0, %53 : vector<56x8xi32>
    %55 = arith.extui %54 : vector<56x8xi1> to vector<56x8xi32>
    %56 = arith.sitofp %55 : vector<56x8xi32> to vector<56x8xf32>
    %57 = arith.addf %50, %56 : vector<56x8xf32>
    %c8_i32 = arith.constant 8 : i32
    %c0_7 = arith.constant 0 : index
    %c0_8 = arith.constant 0 : index
    %58 = vector.load %arg2[%c0_7, %c0_8] : memref<56x128xf32, #tpu.memory_space<vmem>>, vector<56x128xf32>
    %cst_9 = arith.constant dense<0.000000e+00> : vector<8x128xf32>
    %59 = tpu.matmul %57, %58, %cst_9 {dimension_numbers = #tpu.dot_dimension_numbers<[0], [0], [1], [1], [0, 1, 1, 1], [], []>} : vector<56x8xf32>, vector<56x128xf32>, vector<8x128xf32> -> vector<8x128xf32>
    %cst_10 = arith.constant 1.250000e-01 : f32
    %60 = vector.broadcast %cst_10 : f32 to vector<8x128xf32>
    %61 = arith.mulf %59, %60 : vector<8x128xf32>
    %c0_11 = arith.constant 0 : index
    %c0_12 = arith.constant 0 : index
    %62 = vector.load %arg3[%c0_11, %c0_12] : memref<128x128xf32, #tpu.memory_space<vmem>>, vector<128x128xf32>
    %cst_13 = arith.constant dense<0.000000e+00> : vector<8x128xf32>
    %63 = tpu.matmul %61, %62, %cst_13 {dimension_numbers = #tpu.dot_dimension_numbers<[1], [0], [0], [1], [0, 0, 1, 1], [], []>} : vector<8x128xf32>, vector<128x128xf32>, vector<8x128xf32> -> vector<8x128xf32>
    %c0_14 = arith.constant 0 : index
    %c0_15 = arith.constant 0 : index
    %64 = vector.load %arg4[%c0_14, %c0_15] : memref<1x128xf32, #tpu.memory_space<vmem>>, vector<1x128xf32>
    %65 = vector.broadcast %64 : vector<1x128xf32> to vector<8x128xf32>
    %66 = arith.addf %63, %65 : vector<8x128xf32>
    %cst_16 = arith.constant 0.000000e+00 : f32
    %67 = vector.broadcast %cst_16 : f32 to vector<8x128xf32>
    %68 = arith.maximumf %66, %67 : vector<8x128xf32>
    %c0_17 = arith.constant 0 : index
    %c0_18 = arith.constant 0 : index
    %69 = vector.load %arg5[%c0_17, %c0_18] : memref<128x128xf32, #tpu.memory_space<vmem>>, vector<128x128xf32>
    %cst_19 = arith.constant dense<0.000000e+00> : vector<8x128xf32>
    %70 = tpu.matmul %68, %69, %cst_19 {dimension_numbers = #tpu.dot_dimension_numbers<[1], [0], [0], [1], [0, 0, 1, 1], [], []>} : vector<8x128xf32>, vector<128x128xf32>, vector<8x128xf32> -> vector<8x128xf32>
    %c0_20 = arith.constant 0 : index
    %c0_21 = arith.constant 0 : index
    %71 = vector.load %arg6[%c0_20, %c0_21] : memref<1x128xf32, #tpu.memory_space<vmem>>, vector<1x128xf32>
    %72 = vector.broadcast %71 : vector<1x128xf32> to vector<8x128xf32>
    %73 = arith.addf %70, %72 : vector<8x128xf32>
    %c0_22 = arith.constant 0 : index
    %c0_23 = arith.constant 0 : index
    %74 = vector.load %arg7[%c0_22, %c0_23] : memref<8x128xf32, #tpu.memory_space<vmem>>, vector<8x128xf32>
    tpu.vector_store %arg7[%c0_22, %c0_23], %73 {strides = array<i32>} : memref<8x128xf32, #tpu.memory_space<vmem>>, vector<8x128xf32>,
    return
  }
  func.func @transform_0(%arg0: i32) -> (i32, i32) {
    %c0_i32 = arith.constant 0 : i32
    %c0_i32_0 = arith.constant 0 : i32
    return %c0_i32, %arg0 : i32, i32
  }
  func.func @transform_1(%arg0: i32) -> (i32, i32) {
    %c0_i32 = arith.constant 0 : i32
    %c0_i32_0 = arith.constant 0 : i32
    %c0_i32_1 = arith.constant 0 : i32
    return %c0_i32, %c0_i32_0 : i32, i32
  }
  func.func @transform_2(%arg0: i32) -> (i32, i32) {
    %c0_i32 = arith.constant 0 : i32
    %c0_i32_0 = arith.constant 0 : i32
    %c0_i32_1 = arith.constant 0 : i32
    return %c0_i32, %c0_i32_0 : i32, i32
  }
  func.func @transform_3(%arg0: i32) -> (i32, i32) {
    %c0_i32 = arith.constant 0 : i32
    %c0_i32_0 = arith.constant 0 : i32
    %c0_i32_1 = arith.constant 0 : i32
    return %c0_i32, %c0_i32_0 : i32, i32
  }
  func.func @transform_4(%arg0: i32) -> (i32, i32) {
    %c0_i32 = arith.constant 0 : i32
    %c0_i32_0 = arith.constant 0 : i32
    %c0_i32_1 = arith.constant 0 : i32
    return %c0_i32, %c0_i32_0 : i32, i32
  }
  func.func @transform_5(%arg0: i32) -> (i32, i32) {
    %c0_i32 = arith.constant 0 : i32
    %c0_i32_0 = arith.constant 0 : i32
    %c0_i32_1 = arith.constant 0 : i32
    return %c0_i32, %c0_i32_0 : i32, i32
  }
  func.func @transform_6(%arg0: i32) -> (i32, i32) {
    %c0_i32 = arith.constant 0 : i32
    %c0_i32_0 = arith.constant 0 : i32
    return %arg0, %c0_i32 : i32, i32
  }
}

</mosaic_0001>

<bundles_post_ra>
// kernel: tpu_custom_call.1
= control target key start
LH: loop header
LB: loop body
LE: loop exit
PB: predicated region body
PF: predicated region fallthrough
CT: control target
= control target key end

     0   :  { %11 = vsyncpa [#allocation3], 0  ;;  %s978_s0 = inlined_call_operand.hbm [shape: s32[8,8], index: 0, kind: input, shape index: {}]   ;;  %s979_s1 = inlined_call_operand.hbm [shape: f32[56,128], index: 1, kind: input, shape index: {}]   ;;  %s980_s2 = inlined_call_operand.hbm [shape: f32[128,128], index: 2, kind: input, shape index: {}]   ;;  %s981_s3 = inlined_call_operand.vmem [shape: f32[1,128], index: 3, kind: input, shape index: {}]   ;;  %s982_s4 = inlined_call_operand.hbm [shape: f32[128,128], index: 4, kind: input, shape index: {}]   ;;  %s983_s5 = inlined_call_operand.vmem [shape: f32[1,128], index: 5, kind: input, shape index: {}]   ;;  %s984_s6 = inlined_call_operand.hbm [shape: f32[8,128], index: 6, kind: output, shape index: {}]  }
   0x1   :  { %12 = vsyncpa [#allocation6], 0 }
   0x2   :  { %13 = vsyncpa [#allocation9], 0  ;;  %s30_s23 = sshll.u32 %s979_s1, 4  ;;  %s31_s23 = int_to_ptr.hbm [resolvable:$true] %s30_s23 }
   0x3   :  { %14 = vsyncpa [#allocation4], 0  ;;  %s701_s24 = smov [#allocation5]   ;;  %s20_s28 = sshll.u32 %s978_s0, 4  ;;  %s21_s28 = int_to_ptr.hbm [resolvable:$true] %s20_s28 }
   0x4   :  { %s32_s25 = sshll.u32 %s701_s24, 4  ;;  %s702_s29 = smov 128   ;;  %s33_s25 = int_to_ptr.vmem [resolvable:$true] %s32_s25 }
   0x5   :  { %s703_s30 = smov 8   ;;  %s704_s7 = smov [#allocation2]  }
   0x6   :  { %38 = dma.hbm_to_vmem [thread:$0]  %s31_s23, 896, %s33_s25, [#allocation6], %s702_s29, %s702_s29, %s703_s30  }
   0x7   :  { %s22_s8 = sshll.u32 %s704_s7, 4  ;;  %s43_s11 = sshll.u32 %s980_s2, 4  ;;  %s23_s8 = int_to_ptr.vmem [resolvable:$true] %s22_s8  ;;  %s44_s11 = int_to_ptr.hbm [resolvable:$true] %s43_s11 }
   0x8   :  { %25 = dma.hbm_to_vmem [thread:$0]  %s21_s28, 128, %s23_s8, [#allocation3]  }
   0x9   :  { %s58_s13 = sshll.u32 %s982_s4, 4  ;;  %s705_s14 = smov [#allocation7]   ;;  %s59_s13 = int_to_ptr.hbm [resolvable:$true] %s58_s13 }
   0xa   :  { %s45_s15 = sshll.u32 %s705_s14, 4  ;;  %s706_s0 = smov [#allocation8]   ;;  %s46_s15 = int_to_ptr.vmem [resolvable:$true] %s45_s15 }
   0xb   :  { %51 = dma.hbm_to_vmem [thread:$0]  %s44_s11, 2048, %s46_s15, [#allocation6], %s702_s29, %s702_s29, %s703_s30  }
   0xc   :  { %s60_s16 = sshll.u32 %s706_s0, 4  ;;  %s61_s16 = int_to_ptr.vmem [resolvable:$true] %s60_s16 }
   0xd   :  { %66 = dma.hbm_to_vmem [thread:$0]  %s59_s13, 2048, %s61_s16, [#allocation9], %s702_s29, %s702_s29, %s703_s30  }
   0xe   :  { %693 = dma.done.wait [#allocation3], 128  }
   0xf   :  { %694 = vsyncadd [#allocation3], 4294967168 }
  0x10   :  { %695 = dma.done.wait [#allocation6], 2944  }
  0x11   :  { %696 = vsyncadd [#allocation6], 4294964352 }
  0x12   :  { %697 = dma.done.wait [#allocation9], 2048  }
  0x13   :  { %698 = vsyncadd [#allocation9], 4294965248  ;;  %v85_v0 = vlaneseq  ;;  %v764_v4 = vld [vmem:[#allocation2] ss:$0 sm:$0xff]  ;;  %v766_v5 = vld [vmem:[#allocation2 + $0x1] ss:$0 sm:$0xff] }
  0x14   :  { %v768_v6 = vld [vmem:[#allocation2 + $0x2] ss:$0 sm:$0xff]  ;;  %v772_v7 = vld [vmem:[#allocation2 + $0x3] ss:$0 sm:$0xff]  ;;  %v707_v8 = vmov 0.0   ;;  %s708_s19 = smov [#allocation10]  }
  0x15   :  { %v756_v1 = vshrl.u32 %v85_v0, 7  ;;  %v781_v10 = vld [vmem:[#allocation2 + $0x4] ss:$0 sm:$0xff]  ;;  %v788_v14 = vld [vmem:[#allocation2 + $0x5] ss:$0 sm:$0xff]  ;;  %s484_s20 = sshll.u32 %s708_s19, 4  ;;  %s485_s20 = int_to_ptr.vmem [resolvable:$true] %s484_s20 }
  0x16   :  { %v794_v16 = vld [vmem:[#allocation2 + $0x6] ss:$0 sm:$0xff]  ;;  %v801_v20 = vld [vmem:[#allocation2 + $0x7] ss:$0 sm:$0xff]  ;;  %s486_s23 = sshll.u32 %s984_s6, 4  ;;  %s487_s23 = int_to_ptr.hbm [resolvable:$true] %s486_s23 }
  0x17   :  { %v759_v2 = vadd.s32 8, %v756_v1  ;;  %v762_v3 = vadd.s32 16, %v756_v1  ;;  %vm95_vm0 = vcmp.eq.s32.totalorder %v756_v1, %v764_v4  ;;  %vm125_vm2 = vcmp.eq.s32.totalorder %v756_v1, %v766_v5 }
  0x18   :  { %v498_v9 = vsel %vm95_vm0, 1.0, %v707_v8  ;;  %vm155_vm3 = vcmp.eq.s32.totalorder %v756_v1, %v768_v6  ;;  %v505_v12 = vsel %vm125_vm2, 1.0, %v707_v8  ;;  %vm185_vm4 = vcmp.eq.s32.totalorder %v756_v1, %v772_v7 }
  0x19   :  { %vm96_vm1 = vcmp.eq.s32.totalorder %v759_v2, %v764_v4  ;;  %v512_v13 = vsel %vm155_vm3, 1.0, %v707_v8  ;;  %vm126_vm5 = vcmp.eq.s32.totalorder %v759_v2, %v766_v5  ;;  %v146_v15 = vadd.f32 %v505_v12, %v498_v9 }
  0x1a   :  { %v499_v11 = vsel %vm96_vm1, 1.0, %v707_v8  ;;  %vm215_vm6 = vcmp.eq.s32.totalorder %v756_v1, %v781_v10  ;;  %v506_v17 = vsel %vm126_vm5, 1.0, %v707_v8  ;;  %v798_v18 = vadd.s32 24, %v756_v1 }
  0x1b   :  { %v519_v19 = vsel %vm185_vm4, 1.0, %v707_v8  ;;  %v147_v21 = vadd.f32 %v506_v17, %v499_v11  ;;  %vm156_vm7 = vcmp.eq.s32.totalorder %v759_v2, %v768_v6  ;;  %vm97_vm8 = vcmp.eq.s32.totalorder %v762_v3, %v764_v4 }
  0x1c   :  { %v176_v22 = vadd.f32 %v512_v13, %v146_v15  ;;  %v526_v23 = vsel %vm215_vm6, 1.0, %v707_v8  ;;  %vm245_vm9 = vcmp.eq.s32.totalorder %v756_v1, %v788_v14  ;;  %v513_v24 = vsel %vm156_vm7, 1.0, %v707_v8 }
  0x1d   :  { %vm275_vm10 = vcmp.eq.s32.totalorder %v756_v1, %v794_v16  ;;  %vm305_vm11 = vcmp.eq.s32.totalorder %v756_v1, %v801_v20  ;;  %v177_v25 = vadd.f32 %v513_v24, %v147_v21  ;;  %vm186_vm12 = vcmp.eq.s32.totalorder %v759_v2, %v772_v7 }
  0x1e   :  { %v206_v26 = vadd.f32 %v519_v19, %v176_v22  ;;  %v520_v27 = vsel %vm186_vm12, 1.0, %v707_v8  ;;  %vm216_vm13 = vcmp.eq.s32.totalorder %v759_v2, %v781_v10  ;;  %vm98_vm14 = vcmp.eq.s32.totalorder %v798_v18, %v764_v4 }
  0x1f   :  { %v533_v28 = vsel %vm245_vm9, 1.0, %v707_v8  ;;  %v207_v29 = vadd.f32 %v520_v27, %v177_v25  ;;  %v527_v30 = vsel %vm216_vm13, 1.0, %v707_v8  ;;  %vm246_vm15 = vcmp.eq.s32.totalorder %v759_v2, %v788_v14 }
  0x20   :  { %v236_v31 = vadd.f32 %v526_v23, %v206_v26  ;;  %v540_v32 = vsel %vm275_vm10, 1.0, %v707_v8  ;;  %v547_v33 = vsel %vm305_vm11, 1.0, %v707_v8  ;;  %v534_v34 = vsel %vm246_vm15, 1.0, %v707_v8 }
  0x21   :  { %v237_v35 = vadd.f32 %v527_v30, %v207_v29  ;;  %vm276_vm0 = vcmp.eq.s32.totalorder %v759_v2, %v794_v16  ;;  %v500_v36 = vsel %vm97_vm8, 1.0, %v707_v8  ;;  %vm127_vm1 = vcmp.eq.s32.totalorder %v762_v3, %v766_v5 }
  0x22   :  { %v266_v37 = vadd.f32 %v533_v28, %v236_v31  ;;  %v507_v38 = vsel %vm127_vm1, 1.0, %v707_v8  ;;  %vm157_vm2 = vcmp.eq.s32.totalorder %v762_v3, %v768_v6  ;;  %vm187_vm3 = vcmp.eq.s32.totalorder %v762_v3, %v772_v7 }
  0x23   :  { %v267_v39 = vadd.f32 %v534_v34, %v237_v35  ;;  %vm306_vm4 = vcmp.eq.s32.totalorder %v759_v2, %v801_v20  ;;  %v148_v40 = vadd.f32 %v507_v38, %v500_v36  ;;  %v514_v41 = vsel %vm157_vm2, 1.0, %v707_v8  ;;  %v339_v36 = vld [vmem:[#allocation5 + $0x30] sm:$0xff] }
  0x24   :  { %v296_v42 = vadd.f32 %v540_v32, %v266_v37  ;;  %v541_v43 = vsel %vm276_vm0, 1.0, %v707_v8  ;;  %v521_v44 = vsel %vm187_vm3, 1.0, %v707_v8  ;;  %vm217_vm5 = vcmp.eq.s32.totalorder %v762_v3, %v781_v10  ;;  %v338_v37 = vld [vmem:[#allocation5 + $0x28] sm:$0xff]  ;;  %385 = vmatpush.msra.mxu0 %v339_v36  ;;  %v445_v36 = vld [vmem:[#allocation8 + $0x38] sm:$0xff] }
  0x25   :  { %v178_v45 = vadd.f32 %v514_v41, %v148_v40  ;;  %vm247_vm6 = vcmp.eq.s32.totalorder %v762_v3, %v788_v14  ;;  %v548_v47 = vsel %vm306_vm4, 1.0, %v707_v8  ;;  %v528_v48 = vsel %vm217_vm5, 1.0, %v707_v8 }
  0x26   :  { %v326_v46 = vadd.f32 %v547_v33, %v296_v42  ;;  %v501_v49 = vsel %vm98_vm14, 1.0, %v707_v8  ;;  %v297_v50 = vadd.f32 %v541_v43, %v267_v39  ;;  %vm277_vm7 = vcmp.eq.s32.totalorder %v762_v3, %v794_v16  ;;  %386 = vmatpush.msra.mxu0 %v338_v37  ;;  %v444_v37 = vld [vmem:[#allocation8 + $0x30] sm:$0xff] }
  0x27   :  { %v208_v51 = vadd.f32 %v521_v44, %v178_v45  ;;  %vm128_vm8 = vcmp.eq.s32.totalorder %v798_v18, %v766_v5  ;;  %v535_v52 = vsel %vm247_vm6, 1.0, %v707_v8  ;;  %vm158_vm9 = vcmp.eq.s32.totalorder %v798_v18, %v768_v6  ;;  %v336_v45 = vld [vmem:[#allocation5 + $0x18] sm:$0xff] }
  0x28   :  { %340 = vxpose.xlu0.b32.start [1/7] (short) (narrow) %v326_v46, 8  ;;  %v508_v53 = vsel %vm128_vm8, 1.0, %v707_v8  ;;  %vm188_vm10 = vcmp.eq.s32.totalorder %v798_v18, %v772_v7  ;;  %v515_v56 = vsel %vm158_vm9, 1.0, %v707_v8  ;;  %vm218_vm11 = vcmp.eq.s32.totalorder %v798_v18, %v781_v10 }
  0x29   :  { %v238_v54 = vadd.f32 %v528_v48, %v208_v51  ;;  %v149_v55 = vadd.f32 %v508_v53, %v501_v49  ;;  %v522_v57 = vsel %vm188_vm10, 1.0, %v707_v8  ;;  %v327_v60 = vadd.f32 %v548_v47, %v297_v50  ;;  %v334_v51 = vld [vmem:[#allocation5 + $0x8] sm:$0xff] }
  0x2a   :  { %v542_v61 = vsel %vm277_vm7, 1.0, %v707_v8  ;;  %v529_v62 = vsel %vm218_vm11, 1.0, %v707_v8  ;;  %v874_v63 = vadd.s32 32, %v756_v1  ;;  %vm307_vm12 = vcmp.eq.s32.totalorder %v762_v3, %v801_v20 }
  0x2b   :  { %v268_v58 = vadd.f32 %v535_v52, %v238_v54  ;;  %v179_v59 = vadd.f32 %v515_v56, %v149_v55  ;;  %vm248_vm13 = vcmp.eq.s32.totalorder %v798_v18, %v788_v14  ;;  %v881_v2 = vadd.s32 40, %v756_v1 }
  0x2c   :  { %vm99_vm14 = vcmp.eq.s32.totalorder %v874_v63, %v764_v4  ;;  %vm129_vm15 = vcmp.eq.s32.totalorder %v874_v63, %v766_v5  ;;  %vm159_vm0 = vcmp.eq.s32.totalorder %v874_v63, %v768_v6  ;;  %vm189_vm1 = vcmp.eq.s32.totalorder %v874_v63, %v772_v7 }
  0x2d   :  { %v209_v0 = vadd.f32 %v522_v57, %v179_v59  ;;  %v298_v3 = vadd.f32 %v542_v61, %v268_v58  ;;  %v502_v11 = vsel %vm99_vm14, 1.0, %v707_v8  ;;  %v509_v12 = vsel %vm129_vm15, 1.0, %v707_v8 }
  0x2e   :  { %v549_v13 = vsel %vm307_vm12, 1.0, %v707_v8  ;;  %v536_v15 = vsel %vm248_vm13, 1.0, %v707_v8  ;;  %v150_v17 = vadd.f32 %v509_v12, %v502_v11  ;;  %v516_v19 = vsel %vm159_vm0, 1.0, %v707_v8  ;;  %v412_v11 = vld [vmem:[#allocation7 + $0x78] sm:$0xff]  ;;  %v411_v12 = vld [vmem:[#allocation7 + $0x70] sm:$0xff] }
  0x2f   :  { %v239_v9 = vadd.f32 %v529_v62, %v209_v0  ;;  %vm278_vm2 = vcmp.eq.s32.totalorder %v798_v18, %v794_v16  ;;  %v523_v21 = vsel %vm189_vm1, 1.0, %v707_v8  ;;  %vm308_vm3 = vcmp.eq.s32.totalorder %v798_v18, %v801_v20  ;;  %v337_v18 = vld [vmem:[#allocation5 + $0x20] sm:$0xff]  ;;  %417 = vmatpush.msra.mxu1 %v412_v11 }
  0x30   :  { %341 = vxpose.xlu0.b32.cont [2/7] (short) (narrow) %v327_v60, 8  ;;  %v180_v22 = vadd.f32 %v516_v19, %v150_v17  ;;  %vm219_vm4 = vcmp.eq.s32.totalorder %v874_v63, %v781_v10  ;;  %v904_v23 = vadd.s32 48, %v756_v1  ;;  %v328_v24 = vadd.f32 %v549_v13, %v298_v3  ;;  %387 = vmatpush.msra.mxu0 %v337_v18  ;;  %v410_v13 = vld [vmem:[#allocation7 + $0x68] sm:$0xff]  ;;  %v407_v17 = vld [vmem:[#allocation7 + $0x50] sm:$0xff] }
  0x31   :  { %v269_v25 = vadd.f32 %v536_v15, %v239_v9  ;;  %vm100_vm5 = vcmp.eq.s32.totalorder %v881_v2, %v764_v4  ;;  %vm130_vm6 = vcmp.eq.s32.totalorder %v881_v2, %v766_v5  ;;  %vm160_vm7 = vcmp.eq.s32.totalorder %v881_v2, %v768_v6  ;;  %418 = vmatpush.msra.mxu1 %v411_v12  ;;  %v409_v15 = vld [vmem:[#allocation7 + $0x60] sm:$0xff]  ;;  %v406_v19 = vld [vmem:[#allocation7 + $0x48] sm:$0xff] }
  0x32   :  { %v210_v26 = vadd.f32 %v523_v21, %v180_v22  ;;  %v503_v27 = vsel %vm100_vm5, 1.0, %v707_v8  ;;  %v510_v28 = vsel %vm130_vm6, 1.0, %v707_v8  ;;  %v543_v29 = vsel %vm278_vm2, 1.0, %v707_v8  ;;  %388 = vmatpush.msra.mxu0 %v336_v45  ;;  %v404_v21 = vld [vmem:[#allocation7 + $0x38] sm:$0xff]  ;;  %v402_v22 = vld [vmem:[#allocation7 + $0x28] sm:$0xff] }
  0x33   :  { %v530_v1 = vsel %vm219_vm4, 1.0, %v707_v8  ;;  %v151_v30 = vadd.f32 %v510_v28, %v503_v27  ;;  %v517_v31 = vsel %vm160_vm7, 1.0, %v707_v8  ;;  %vm249_vm8 = vcmp.eq.s32.totalorder %v874_v63, %v788_v14  ;;  %419 = vmatpush.msra.mxu1 %v410_v13  ;;  %v398_v27 = vld [vmem:[#allocation7 + $0x8] sm:$0xff]  ;;  %v397_v28 = vld [vmem:[#allocation7] sm:$0xff] }
  0x34   :  { %vm190_vm9 = vcmp.eq.s32.totalorder %v881_v2, %v772_v7  ;;  %v550_v32 = vsel %vm308_vm3, 1.0, %v707_v8  ;;  %v299_v33 = vadd.f32 %v543_v29, %v269_v25  ;;  %v240_v34 = vadd.f32 %v530_v1, %v210_v26  ;;  %v399_v25 = vld [vmem:[#allocation7 + $0x10] sm:$0xff]  ;;  %v453_v29 = vld [vmem:[#allocation8 + $0x78] sm:$0xff] }
  0x35   :  { %v181_v35 = vadd.f32 %v517_v31, %v151_v30  ;;  %vm101_vm10 = vcmp.eq.s32.totalorder %v904_v23, %v764_v4  ;;  %v537_v38 = vsel %vm249_vm8, 1.0, %v707_v8  ;;  %v524_v39 = vsel %vm190_vm9, 1.0, %v707_v8  ;;  %420 = vmatpush.msra.mxu1 %v409_v15  ;;  %v452_v1 = vld [vmem:[#allocation8 + $0x70] sm:$0xff]  ;;  %458 = vmatpush.msra.mxu2 %v453_v29  ;;  %v451_v30 = vld [vmem:[#allocation8 + $0x68] sm:$0xff]  ;;  %v450_v31 = vld [vmem:[#allocation8 + $0x60] sm:$0xff] }
  0x36   :  { %v504_v40 = vsel %vm101_vm10, 1.0, %v707_v8  ;;  %vm131_vm11 = vcmp.eq.s32.totalorder %v904_v23, %v766_v5  ;;  %vm279_vm12 = vcmp.eq.s32.totalorder %v874_v63, %v794_v16  ;;  %vm220_vm13 = vcmp.eq.s32.totalorder %v881_v2, %v781_v10 }
  0x37   :  { %v511_v4 = vsel %vm131_vm11, 1.0, %v707_v8  ;;  %vm161_vm14 = vcmp.eq.s32.totalorder %v904_v23, %v768_v6  ;;  %v329_v41 = vadd.f32 %v550_v32, %v299_v33  ;;  %v270_v42 = vadd.f32 %v537_v38, %v240_v34  ;;  %v335_v6 = vld [vmem:[#allocation5 + $0x10] sm:$0xff]  ;;  %459 = vmatpush.msra.mxu2 %v452_v1  ;;  %v448_v33 = vld [vmem:[#allocation8 + $0x50] sm:$0xff]  ;;  %v447_v34 = vld [vmem:[#allocation8 + $0x48] sm:$0xff] }
  0x38   :  { %342 = vxpose.xlu0.b32.cont [3/7] (short) (narrow) %v328_v24, 8  ;;  %v211_v43 = vadd.f32 %v524_v39, %v181_v35  ;;  %v152_v44 = vadd.f32 %v511_v4, %v504_v40  ;;  %v544_v5 = vsel %vm279_vm12, 1.0, %v707_v8  ;;  %v531_v46 = vsel %vm220_vm13, 1.0, %v707_v8  ;;  %389 = vmatpush.msra.mxu0 %v335_v6  ;;  %v400_v24 = vld [vmem:[#allocation7 + $0x18] sm:$0xff]  ;;  %v446_v35 = vld [vmem:[#allocation8 + $0x40] sm:$0xff]  ;;  %v443_v38 = vld [vmem:[#allocation8 + $0x28] sm:$0xff] }
  0x39   :  { %v518_v47 = vsel %vm161_vm14, 1.0, %v707_v8  ;;  %vm309_vm15 = vcmp.eq.s32.totalorder %v874_v63, %v801_v20  ;;  %vm250_vm0 = vcmp.eq.s32.totalorder %v881_v2, %v788_v14  ;;  %vm191_vm1 = vcmp.eq.s32.totalorder %v904_v23, %v772_v7  ;;  %v333_v7 = vld [vmem:[#allocation5] sm:$0xff]  ;;  %460 = vmatpush.msra.mxu2 %v451_v30  ;;  %v449_v32 = vld [vmem:[#allocation8 + $0x58] sm:$0xff]  ;;  %v442_v39 = vld [vmem:[#allocation8 + $0x20] sm:$0xff] }
  0x3a   :  { %v300_v48 = vadd.f32 %v544_v5, %v270_v42  ;;  %v241_v49 = vadd.f32 %v531_v46, %v211_v43  ;;  %v182_v50 = vadd.f32 %v518_v47, %v152_v44  ;;  %v551_v52 = vsel %vm309_vm15, 1.0, %v707_v8  ;;  %390 = vmatpush.msra.mxu0 %v334_v51  ;;  %v441_v40 = vld [vmem:[#allocation8 + $0x18] sm:$0xff]  ;;  %v439_v42 = vld [vmem:[#allocation8 + $0x8] sm:$0xff]  ;;  %v438_v43 = vld [vmem:[#allocation8] sm:$0xff] }
  0x3b   :  { %v538_v53 = vsel %vm250_vm0, 1.0, %v707_v8  ;;  %v525_v54 = vsel %vm191_vm1, 1.0, %v707_v8  ;;  %vm280_vm2 = vcmp.eq.s32.totalorder %v881_v2, %v794_v16  ;;  %vm221_vm3 = vcmp.eq.s32.totalorder %v904_v23, %v781_v10  ;;  %461 = vmatpush.msra.mxu2 %v450_v31  ;;  %v571_v44 = vld [vmem:[%s981_s3] ss:$0 sm:$0xff] }
  0x3c   :  { %v330_v55 = vadd.f32 %v551_v52, %v300_v48  ;;  %v271_v56 = vadd.f32 %v538_v53, %v241_v49  ;;  %v212_v57 = vadd.f32 %v525_v54, %v182_v50  ;;  %v545_v58 = vsel %vm280_vm2, 1.0, %v707_v8  ;;  %391 = vmatpush.msra.mxu0 %v333_v7  ;;  %v572_v47 = vld [vmem:[%s983_s5] ss:$0 sm:$0xff] }
  0x3d   :  { %v532_v59 = vsel %vm221_vm3, 1.0, %v707_v8  ;;  %vm310_vm4 = vcmp.eq.s32.totalorder %v881_v2, %v801_v20  ;;  %vm251_vm5 = vcmp.eq.s32.totalorder %v904_v23, %v788_v14  ;;  %vm281_vm6 = vcmp.eq.s32.totalorder %v904_v23, %v794_v16  ;;  %v408_v16 = vld [vmem:[#allocation7 + $0x58] sm:$0xff]  ;;  %462 = vmatpush.msra.mxu2 %v449_v32 }
  0x3e   :  { %v301_v60 = vadd.f32 %v545_v58, %v271_v56  ;;  %v242_v61 = vadd.f32 %v532_v59, %v212_v57  ;;  %v552_v10 = vsel %vm310_vm4, 1.0, %v707_v8  ;;  %v539_v62 = vsel %vm251_vm5, 1.0, %v707_v8  ;;  %421 = vmatpush.msra.mxu1 %v408_v16 }
  0x3f   :  { %v546_v3 = vsel %vm281_vm6, 1.0, %v707_v8  ;;  %vm311_vm7 = vcmp.eq.s32.totalorder %v904_v23, %v801_v20  ;;  %v405_v20 = vld [vmem:[#allocation7 + $0x40] sm:$0xff]  ;;  %vm372_vm8 = vcmask 457728   ;;  %463 = vmatpush.msra.mxu2 %v448_v33 }
  0x40   :  { %343 = vxpose.xlu0.b32.cont [4/7] (short) (narrow) %v329_v41, 8  ;;  %v331_v63 = vadd.f32 %v552_v10, %v301_v60  ;;  %v272_v0 = vadd.f32 %v539_v62, %v242_v61  ;;  %v553_v14 = vsel %vm311_vm7, 1.0, %v707_v8  ;;  %422 = vmatpush.msra.mxu1 %v407_v17  ;;  %v403_v8 = vld [vmem:[#allocation7 + $0x30] sm:$0xff]  ;;  %v401_v23 = vld [vmem:[#allocation7 + $0x20] sm:$0xff] }
  0x41   :  { %464 = vmatpush.msra.mxu2 %v447_v34  ;;  %v440_v41 = vld [vmem:[#allocation8 + $0x10] sm:$0xff] }
  0x42   :  { %v302_v2 = vadd.f32 %v546_v3, %v272_v0  ;;  %423 = vmatpush.msra.mxu1 %v406_v19 }
  0x43   :  { %465 = vmatpush.msra.mxu2 %v446_v35 }
  0x44   :  { %v332_v9 = vadd.f32 %v553_v14, %v302_v2  ;;  %424 = vmatpush.msra.mxu1 %v405_v20 }
  0x45   :  { %466 = vmatpush.msra.mxu2 %v445_v36 }
  0x46   :  { %425 = vmatpush.msra.mxu1 %v404_v21 }
  0x47   :  { %467 = vmatpush.msra.mxu2 %v444_v37 }
  0x48   :  { %344 = vxpose.xlu0.b32.cont [5/7] (short) (narrow) %v330_v55, 8  ;;  %426 = vmatpush.msra.mxu1 %v403_v8 }
  0x49   :  { %468 = vmatpush.msra.mxu2 %v443_v38 }
  0x4a   :  { %427 = vmatpush.msra.mxu1 %v402_v22 }
  0x4b   :  { %469 = vmatpush.msra.mxu2 %v442_v39 }
  0x4c   :  { %428 = vmatpush.msra.mxu1 %v401_v23 }
  0x4d   :  { %470 = vmatpush.msra.mxu2 %v441_v40 }
  0x4e   :  { %429 = vmatpush.msra.mxu1 %v400_v24 }
  0x4f   :  { %471 = vmatpush.msra.mxu2 %v440_v41 }
  0x50   :  { %345 = vxpose.xlu0.b32.cont [6/7] (short) (narrow) %v331_v63, 8  ;;  %430 = vmatpush.msra.mxu1 %v399_v25 }
  0x51   :  { %472 = vmatpush.msra.mxu2 %v439_v42 }
  0x52   :  { %431 = vmatpush.msra.mxu1 %v398_v27 }
  0x53   :  { %473 = vmatpush.msra.mxu2 %v438_v43 }
  0x54   :  { %432 = vmatpush.msra.mxu1 %v397_v28 }
  0x58   :  { %346 = vxpose.xlu0.b32.end [7/7] (short) (narrow) %v332_v9, 8 }
  0xcc   :  { %v356_v26 = vpop.trf.xlu0 }
  0xcd   :  { %554 = vmatmul.msk.f32.vlgmr.msra.gmra.mxu0 %vm372_vm8, %v356_v26 }
 0x14a   :  { %v393_v4 = vpop.f32.mrf.mxu0 }
 0x14b   :  { %v396_v18 = vmul.f32 0.125, %v393_v4 }
 0x14d   :  { %433 = vmatmul.f32.vlgmr.msra.gmra.mxu1 %v396_v18 }
 0x1ca   :  { %v434_v45 = vpop.f32.mrf.mxu1 }
 0x1cb   :  { %v435_v5 = vadd.f32 %v571_v44, %v434_v45 }
 0x1cd   :  { %v437_v46 = vmax.f32 %v435_v5, 0.0 }
 0x1cf   :  { %474 = vmatmul.f32.vlgmr.msra.gmra.mxu2 %v437_v46 }
 0x252   :  { %v475_v6 = vpop.f32.mrf.mxu2 }
 0x253   :  { %v476_v48 = vadd.f32 %v572_v47, %v475_v6 }
 0x255   :  { %478 = vst [vmem:[#allocation10] sm:$0xff] %v476_v48 }
 0x256   :  { %489 = dma.vmem_to_hbm [thread:$0]  %s485_s20, 128, %s487_s23, [#allocation4]  }
 0x257   :  { %699 = dma.done.wait [#allocation4], 128  }
 0x258   :  { %700 = vsyncadd [#allocation4], 4294967168 }
 0x259   :  { %494 = vsyncpa [#allocation3], 1 }
 0x25a   :  { %495 = vsyncpa [#allocation6], 1 }
 0x25b   :  { %496 = vsyncpa [#allocation9], 1 }
 0x25c   :  { %497 = vsyncpa [#allocation4], 1 }

</bundles_post_ra>
